<compile_context>
chip_gen: v7x
topology: tpu7x:2x2x1
jax: 0.10.0
libtpu: 0.0.40
codegen_flags: <defaults>
</compile_context>

<pallas_src>
import functools

import jax
import jax.numpy as jnp
from jax.experimental import pallas as pl
from jax.experimental.pallas import tpu as pltpu


def _infonce_kernel(e1_ref, e2_ref, out_ref, m_sc, l_sc, d_sc, *,
                    temp: float, eps: float, valid_b: int, tile_n: int,
                    pad_cols: bool):
    qi = pl.program_id(0)              # row-tile index ("parallel")
    kj = pl.program_id(1)              # column-tile index (reduction, last)

    @pl.when(kj == 0)
    def _():
        m_sc[...] = jnp.full_like(m_sc, -jnp.inf)
        l_sc[...] = jnp.zeros_like(l_sc)

    e1 = e1_ref[...]                   # [T, D] (input dtype)
    e2 = e2_ref[...]                   # [T, D]
    e1f = e1.astype(jnp.float32)
    e2f = e2.astype(jnp.float32)

    # Per-row inverse norms (clamp each norm by eps, like torch CosineSimilarity);
    # fold 1/temp into the e1 scale so the matmul produces logits directly.
    n1 = jnp.sqrt(jnp.sum(e1f * e1f, axis=-1, keepdims=True))   # [T, 1]
    n2 = jnp.sqrt(jnp.sum(e2f * e2f, axis=-1, keepdims=True))   # [T, 1]
    s1 = (1.0 / temp) / jnp.maximum(n1, eps)
    s2 = 1.0 / jnp.maximum(n2, eps)
    e1n = e1f * s1                                               # O(T*D) VPU work
    e2n = e2f * s2

    # MXU: feed the input dtype (bf16 stays bf16), accumulate in f32.
    logits = jax.lax.dot_general(
        e1n.astype(e1.dtype), e2n.astype(e2.dtype),
        dimension_numbers=(((1,), (1,)), ((), ())),
        preferred_element_type=jnp.float32)                      # [T, T]

    if pad_cols:  # static: only emitted when B is not a multiple of the tile
        col = kj * tile_n + jax.lax.broadcasted_iota(jnp.int32, logits.shape, 1)
        logits = jnp.where(col < valid_b, logits, -jnp.inf)

    # Online logsumexp (one exp over the TxT tile per step; rescale is per-row).
    m_prev = m_sc[...]
    m_new = jnp.maximum(m_prev, jnp.max(logits, axis=-1, keepdims=True))
    alpha = jnp.exp(m_prev - m_new)
    l_sc[...] = alpha * l_sc[...] + jnp.sum(jnp.exp(logits - m_new),
                                            axis=-1, keepdims=True)
    m_sc[...] = m_new

    # Diagonal logits = row-wise dot of the normalized (temp-scaled) rows.
    # With square tiles the matching e2 rows are exactly the tile at kj == qi.
    @pl.when(kj == qi)
    def _():
        d_sc[...] = jnp.sum(e1n * e2n, axis=-1, keepdims=True)

    @pl.when(kj == pl.num_programs(1) - 1)
    def _():
        out_ref[...] = m_sc[...] + jnp.log(l_sc[...]) - d_sc[...]


def _default_block(batch: int) -> int:
    # MXU-aligned tiles that fit comfortably in VMEM on all generations
    # (v7x has only 64 MiB; 256x256 f32 logits tile = 256 KiB). On v5e/v6e
    # (128 MiB VMEM) 512 also works if you want fewer grid steps.
    if batch >= 256:
        return 256
    if batch >= 128:
        return 128
    return -(-batch // 8) * 8          # small batch: round up to sublane multiple


def infonce_loss(emb1: jax.Array, emb2: jax.Array, temp: float = 0.5,
                 eps: float = 1e-8, block_b: int | None = None) -> jax.Array:
    assert emb1.shape == emb2.shape and emb1.ndim == 2
    B, D = emb1.shape
    T = _default_block(B) if block_b is None else int(block_b)
    B_pad = -(-B // T) * T

    if B_pad != B:                      # zero-pad ragged batch; masked in-kernel
        pad = B_pad - B
        emb1 = jnp.pad(emb1, ((0, pad), (0, 0)))
        emb2 = jnp.pad(emb2, ((0, pad), (0, 0)))

    kernel = functools.partial(
        _infonce_kernel, temp=float(temp), eps=float(eps),
        valid_b=B, tile_n=T, pad_cols=(B_pad != B))

    per_row = pl.pallas_call(
        kernel,
        out_shape=jax.ShapeDtypeStruct((B_pad, 1), jnp.float32),
        grid=(B_pad // T, B_pad // T),
        in_specs=[
            pl.BlockSpec((T, D), lambda i, j: (i, 0)),   # e1 row tile (resident over j)
            pl.BlockSpec((T, D), lambda i, j: (j, 0)),   # e2 column tiles (streamed)
        ],
        out_specs=pl.BlockSpec((T, 1), lambda i, j: (i, 0)),
        scratch_shapes=[
            pltpu.VMEM((T, 1), jnp.float32),   # running max m_i
            pltpu.VMEM((T, 1), jnp.float32),   # running sum l_i
            pltpu.VMEM((T, 1), jnp.float32),   # diagonal logits
        ],
        compiler_params=pltpu.CompilerParams(
            dimension_semantics=("parallel", "arbitrary")),
    )(emb1, emb2)

    # Finish the mean in the wrapper (drop padded rows).
    return jnp.sum(per_row[:B, 0]) / B


def _infonce_ref(emb1, emb2, temp=0.5, eps=1e-8):
    e1 = emb1.astype(jnp.float32)
    e2 = emb2.astype(jnp.float32)
    n1 = jnp.maximum(jnp.linalg.norm(e1, axis=-1, keepdims=True), eps)
    n2 = jnp.maximum(jnp.linalg.norm(e2, axis=-1, keepdims=True), eps)
    logits = (e1 / n1) @ (e2 / n2).T / temp
    lse = jax.scipy.special.logsumexp(logits, axis=-1)
    return jnp.mean(lse - jnp.diagonal(logits))


if __name__ == "__main__":
    key = jax.random.PRNGKey(0)
    k1, k2 = jax.random.split(key)
    B, D = 16, 32
    emb1 = jax.random.normal(k1, (B, D), dtype=jnp.float32)
    emb2 = jax.random.normal(k2, (B, D), dtype=jnp.float32)

    # Force an 8-wide tile so the 2x2 grid / online-logsumexp path is exercised.
    loss = jax.block_until_ready(infonce_loss(emb1, emb2, temp=0.5, block_b=8))
    ref = _infonce_ref(emb1, emb2, temp=0.5)
    assert jnp.allclose(loss, ref, rtol=1e-5, atol=1e-5), (loss, ref)

    # Ragged batch (B not a multiple of the tile): exercises padding + masking.
    e1b, e2b = emb1[:13], emb2[:13]
    loss_b = jax.block_until_ready(infonce_loss(e1b, e2b, temp=0.5, block_b=8))
    ref_b = _infonce_ref(e1b, e2b, temp=0.5)
    assert jnp.allclose(loss_b, ref_b, rtol=1e-5, atol=1e-5), (loss_b, ref_b)

    print("KERNEL_OK")
</pallas_src>

<mosaic_0001>
module attributes {stable_mosaic.version = 11 : i64} {
  func.func @_infonce_kernel(%arg0: i32, %arg1: i32, %arg2: memref<8x32xf32, #tpu.memory_space<vmem>>, %arg3: memref<8x32xf32, #tpu.memory_space<vmem>>, %arg4: memref<8x1xf32, #tpu.memory_space<vmem>>, %arg5: memref<8x1xf32, #tpu.memory_space<vmem>>, %arg6: memref<8x1xf32, #tpu.memory_space<vmem>>, %arg7: memref<8x1xf32, #tpu.memory_space<vmem>>) attributes {dimension_semantics = [#tpu.dimension_semantics<parallel>, #tpu.dimension_semantics<arbitrary>], iteration_bounds = array<i64: 2, 2>, scalar_prefetch = 0 : i64, scratch_operands = 3 : i64, tpu.core_type = #tpu.core_type<tc>, window_params = [{transform_indices = @transform_0, window_bounds = array<i64: 8, 32>}, {transform_indices = @transform_1, window_bounds = array<i64: 8, 32>}, {transform_indices = @transform_2, window_bounds = array<i64: 8, 1>}]} {
    %c0_i32 = arith.constant 0 : i32
    %0 = arith.cmpi eq, %arg1, %c0_i32 : i32
    %1 = arith.extui %0 : i1 to i32
    %c0_i32_0 = arith.constant 0 : i32
    %2 = arith.cmpi ne, %1, %c0_i32_0 : i32
    scf.if %2 {
      %cst_22 = arith.constant 0xFF800000 : f32
      %48 = vector.broadcast %cst_22 : f32 to vector<8x1xf32>
      %c0_23 = arith.constant 0 : index
      %c0_24 = arith.constant 0 : index
      %49 = vector.load %arg5[%c0_23, %c0_24] : memref<8x1xf32, #tpu.memory_space<vmem>>, vector<8x1xf32>
      tpu.vector_store %arg5[%c0_23, %c0_24], %48 {strides = array<i32>} : memref<8x1xf32, #tpu.memory_space<vmem>>, vector<8x1xf32>,
      %cst_25 = arith.constant 0.000000e+00 : f32
      %50 = vector.broadcast %cst_25 : f32 to vector<8x1xf32>
      %c0_26 = arith.constant 0 : index
      %c0_27 = arith.constant 0 : index
      %51 = vector.load %arg6[%c0_26, %c0_27] : memref<8x1xf32, #tpu.memory_space<vmem>>, vector<8x1xf32>
      tpu.vector_store %arg6[%c0_26, %c0_27], %50 {strides = array<i32>} : memref<8x1xf32, #tpu.memory_space<vmem>>, vector<8x1xf32>,
    } else {
    }
    %c0 = arith.constant 0 : index
    %c0_1 = arith.constant 0 : index
    %3 = vector.load %arg2[%c0, %c0_1] : memref<8x32xf32, #tpu.memory_space<vmem>>, vector<8x32xf32>
    %c0_2 = arith.constant 0 : index
    %c0_3 = arith.constant 0 : index
    %4 = vector.load %arg3[%c0_2, %c0_3] : memref<8x32xf32, #tpu.memory_space<vmem>>, vector<8x32xf32>
    %5 = arith.mulf %3, %3 : vector<8x32xf32>
    %cst = arith.constant dense<0.000000e+00> : vector<8xf32>
    %6 = vector.multi_reduction <add>, %5, %cst [1] : vector<8x32xf32> to vector<8xf32>
    %7 = vector.shape_cast %6 : vector<8xf32> to vector<8x1xf32>
    %8 = math.sqrt %7 : vector<8x1xf32>
    %9 = arith.mulf %4, %4 : vector<8x32xf32>
    %cst_4 = arith.constant dense<0.000000e+00> : vector<8xf32>
    %10 = vector.multi_reduction <add>, %9, %cst_4 [1] : vector<8x32xf32> to vector<8xf32>
    %11 = vector.shape_cast %10 : vector<8xf32> to vector<8x1xf32>
    %12 = math.sqrt %11 : vector<8x1xf32>
    %cst_5 = arith.constant 9.99999993E-9 : f32
    %13 = vector.broadcast %cst_5 : f32 to vector<8x1xf32>
    %14 = arith.maximumf %8, %13 : vector<8x1xf32>
    %cst_6 = arith.constant 2.000000e+00 : f32
    %15 = vector.broadcast %cst_6 : f32 to vector<8x1xf32>
    %16 = arith.divf %15, %14 : vector<8x1xf32>
    %cst_7 = arith.constant 9.99999993E-9 : f32
    %17 = vector.broadcast %cst_7 : f32 to vector<8x1xf32>
    %18 = arith.maximumf %12, %17 : vector<8x1xf32>
    %cst_8 = arith.constant 1.000000e+00 : f32
    %19 = vector.broadcast %cst_8 : f32 to vector<8x1xf32>
    %20 = arith.divf %19, %18 : vector<8x1xf32>
    %21 = vector.broadcast %16 : vector<8x1xf32> to vector<8x32xf32>
    %22 = arith.mulf %3, %21 : vector<8x32xf32>
    %23 = vector.broadcast %20 : vector<8x1xf32> to vector<8x32xf32>
    %24 = arith.mulf %4, %23 : vector<8x32xf32>
    %cst_9 = arith.constant dense<0.000000e+00> : vector<8x8xf32>
    %25 = tpu.matmul %22, %24, %cst_9 {dimension_numbers = #tpu.dot_dimension_numbers<[1], [1], [0], [0], [0, 0, 1, 0], [], []>} : vector<8x32xf32>, vector<8x32xf32>, vector<8x8xf32> -> vector<8x8xf32>
    %c0_10 = arith.constant 0 : index
    %c0_11 = arith.constant 0 : index
    %26 = vector.load %arg5[%c0_10, %c0_11] : memref<8x1xf32, #tpu.memory_space<vmem>>, vector<8x1xf32>
    %cst_12 = arith.constant dense<0xFF800000> : vector<8xf32>
    %27 = vector.multi_reduction <maximumf>, %25, %cst_12 [1] : vector<8x8xf32> to vector<8xf32>
    %28 = vector.shape_cast %27 : vector<8xf32> to vector<8x1xf32>
    %29 = arith.maximumf %26, %28 : vector<8x1xf32>
    %30 = arith.subf %26, %29 : vector<8x1xf32>
    %31 = math.exp %30 : vector<8x1xf32>
    %c0_13 = arith.constant 0 : index
    %c0_14 = arith.constant 0 : index
    %32 = vector.load %arg6[%c0_13, %c0_14] : memref<8x1xf32, #tpu.memory_space<vmem>>, vector<8x1xf32>
    %33 = arith.mulf %31, %32 : vector<8x1xf32>
    %34 = vector.broadcast %29 : vector<8x1xf32> to vector<8x8xf32>
    %35 = arith.subf %25, %34 : vector<8x8xf32>
    %36 = math.exp %35 : vector<8x8xf32>
    %cst_15 = arith.constant dense<0.000000e+00> : vector<8xf32>
    %37 = vector.multi_reduction <add>, %36, %cst_15 [1] : vector<8x8xf32> to vector<8xf32>
    %38 = vector.shape_cast %37 : vector<8xf32> to vector<8x1xf32>
    %39 = arith.addf %33, %38 : vector<8x1xf32>
    %c0_16 = arith.constant 0 : index
    %c0_17 = arith.constant 0 : index
    %40 = vector.load %arg6[%c0_16, %c0_17] : memref<8x1xf32, #tpu.memory_space<vmem>>, vector<8x1xf32>
    tpu.vector_store %arg6[%c0_16, %c0_17], %39 {strides = array<i32>} : memref<8x1xf32, #tpu.memory_space<vmem>>, vector<8x1xf32>,
    %c0_18 = arith.constant 0 : index
    %c0_19 = arith.constant 0 : index
    %41 = vector.load %arg5[%c0_18, %c0_19] : memref<8x1xf32, #tpu.memory_space<vmem>>, vector<8x1xf32>
    tpu.vector_store %arg5[%c0_18, %c0_19], %29 {strides = array<i32>} : memref<8x1xf32, #tpu.memory_space<vmem>>, vector<8x1xf32>,
    %42 = arith.cmpi eq, %arg1, %arg0 : i32
    %43 = arith.extui %42 : i1 to i32
    %c0_i32_20 = arith.constant 0 : i32
    %44 = arith.cmpi ne, %43, %c0_i32_20 : i32
    scf.if %44 {
      %48 = arith.mulf %22, %24 : vector<8x32xf32>
      %cst_22 = arith.constant dense<0.000000e+00> : vector<8xf32>
      %49 = vector.multi_reduction <add>, %48, %cst_22 [1] : vector<8x32xf32> to vector<8xf32>
      %50 = vector.shape_cast %49 : vector<8xf32> to vector<8x1xf32>
      %c0_23 = arith.constant 0 : index
      %c0_24 = arith.constant 0 : index
      %51 = vector.load %arg7[%c0_23, %c0_24] : memref<8x1xf32, #tpu.memory_space<vmem>>, vector<8x1xf32>
      tpu.vector_store %arg7[%c0_23, %c0_24], %50 {strides = array<i32>} : memref<8x1xf32, #tpu.memory_space<vmem>>, vector<8x1xf32>,
    } else {
    }
    %c1_i32 = arith.constant 1 : i32
    %45 = arith.cmpi eq, %arg1, %c1_i32 : i32
    %46 = arith.extui %45 : i1 to i32
    %c0_i32_21 = arith.constant 0 : i32
    %47 = arith.cmpi ne, %46, %c0_i32_21 : i32
    scf.if %47 {
      %c0_22 = arith.constant 0 : index
      %c0_23 = arith.constant 0 : index
      %48 = vector.load %arg5[%c0_22, %c0_23] : memref<8x1xf32, #tpu.memory_space<vmem>>, vector<8x1xf32>
      %c0_24 = arith.constant 0 : index
      %c0_25 = arith.constant 0 : index
      %49 = vector.load %arg6[%c0_24, %c0_25] : memref<8x1xf32, #tpu.memory_space<vmem>>, vector<8x1xf32>
      %50 = math.log %49 : vector<8x1xf32>
      %51 = arith.addf %48, %50 : vector<8x1xf32>
      %c0_26 = arith.constant 0 : index
      %c0_27 = arith.constant 0 : index
      %52 = vector.load %arg7[%c0_26, %c0_27] : memref<8x1xf32, #tpu.memory_space<vmem>>, vector<8x1xf32>
      %53 = arith.subf %51, %52 : vector<8x1xf32>
      %c0_28 = arith.constant 0 : index
      %c0_29 = arith.constant 0 : index
      %54 = vector.load %arg4[%c0_28, %c0_29] : memref<8x1xf32, #tpu.memory_space<vmem>>, vector<8x1xf32>
      tpu.vector_store %arg4[%c0_28, %c0_29], %53 {strides = array<i32>} : memref<8x1xf32, #tpu.memory_space<vmem>>, vector<8x1xf32>,
    } else {
    }
    return
  }
  func.func @transform_0(%arg0: i32, %arg1: i32) -> (i32, i32) {
    %c0_i32 = arith.constant 0 : i32
    %c0_i32_0 = arith.constant 0 : i32
    return %arg0, %c0_i32 : i32, i32
  }
  func.func @transform_1(%arg0: i32, %arg1: i32) -> (i32, i32) {
    %c0_i32 = arith.constant 0 : i32
    %c0_i32_0 = arith.constant 0 : i32
    return %arg1, %c0_i32 : i32, i32
  }
  func.func @transform_2(%arg0: i32, %arg1: i32) -> (i32, i32) {
    %c0_i32 = arith.constant 0 : i32
    %c0_i32_0 = arith.constant 0 : i32
    return %arg0, %c0_i32 : i32, i32
  }
}

</mosaic_0001>

<bundles_post_ra>
// kernel: tpu_custom_call.1
= control target key start
LH: loop header
LB: loop body
LE: loop exit
PB: predicated region body
PF: predicated region fallthrough
CT: control target
= control target key end

     0   :  { %7 = vsyncpa [#allocation6], 0  ;;  %s1063_s0 = inlined_call_operand.hbm [shape: f32[16,32], index: 0, kind: input, shape index: {}]   ;;  %s1064_s1 = inlined_call_operand.hbm [shape: f32[16,32], index: 1, kind: input, shape index: {}]   ;;  %s1065_s2 = inlined_call_operand.vmem [shape: f32[16,1], index: 2, kind: output, shape index: {}]  }
   0x1   :  { %9 = vsyncpa [#allocation6 + $0x1], 0 }
   0x2   :  { %10 = vsyncpa [#allocation8], 0 }
   0x3   :  { %12 = vsyncpa [#allocation8 + $0x1], 0  ;;  %s795_s9 = smov 0   ;;  %s797_s10 = smov 0  }
   0x4   :  { %s799_s11 = smov 0   ;;  %s801_s12 = smov 0  }
   0x5   :  { %s803_s13 = smov 0   ;;  %s805_s14 = smov 0  }
   0x6   :  { %s807_s15 = smov 0   ;;  %s809_s16 = smov 0  }
   0x7   :  { %s811_s17 = smov 0   ;;  %s813_s18 = smov 0  }
   0x8   :  { %s815_s19 = smov 0  }
   0x9 LB: > { %s470_s20 = sadd.s32 4294967295, %s771_s19   ;;  %s30_s21 = sadd.s32 1, %s767_s18  ;;  %s771_s19 = sphi %s815_s19, %s18_s19   ;;  %s767_s18 = sphi %s813_s18, %s1092_s18   ;;  %s763_s17 = sphi %s811_s17, %s1091_s17   ;;  %s759_s16 = sphi %s809_s16, %s1090_s16   ;;  %s755_s15 = sphi %s807_s15, %s1089_s15   ;;  %s751_s14 = sphi %s805_s14, %s1088_s14   ;;  %s747_s13 = sphi %s803_s13, %s1087_s13   ;;  %s743_s12 = sphi %s801_s12, %s1086_s12   ;;  %s739_s11 = sphi %s799_s11, %s1085_s11   ;;  %s735_s10 = sphi %s797_s10, %s1084_s10   ;;  %s731_s9 = sphi %s795_s9, %s1083_s9  }
   0xa   : > { %p44_p0 = scmp.ne.s32.totalorder %s751_s14, %s747_s13  ;;  %p1067_p1 = scmp.eq.s32.totalorder %s771_s19, 0 }
   0xb   : > { %p50_p2 = scmp.ne.s32.totalorder %s747_s13, %s743_s12  ;;  %p854_p3 = scmp.eq.s32.totalorder %s470_s20, 0 }
   0xc   : > { %p46_p4 = por %p1067_p1, %p44_p0  ;;  %p1066_p5 = scmp.lt.s32.totalorder %s771_s19, 4 }
   0xd   : > { %p863_p6 = por %p854_p3, %p50_p2  ;;  %s126_s24 = sand.u32 1, %s751_s14  }
   0xe   : > { %s474_s25 = sshll.u32 %s126_s24, 3  ;;  %s475_s26 = sshll.u32 %s767_s18, 7 }
   0xf   : > { %s1071_s23 = scalar_select %p863_p6, 1, 0 }
  0x10   : > { %s872_s29 = scalar_lea.hbm %s1063_s0, %s475_s26  ;;  %s130_s30 = scalar_lea.vmem [#allocation5], %s474_s25 }
  0x11   : > { %s137_s3 = sshll.u32 %s130_s30, 4  ;;  %p878_p7 = pnand %p1066_p5, %p46_p4  ;;  %s874_s3 = int_to_ptr.vmem [resolvable:$true] %s137_s3 }
  0x12   : > { %s127_s5 = scalar_lea.sflag [#allocation6], %s126_s24  ;;  %s617_s6 = scalar_lea.hbm %s872_s29, 128 }
  0x13   : > { %p618_p10 = scmp.ne.s32.totalorder %s872_s29, %s617_s6  ;;  %p619_p11 = pneg %p878_p7 }
  0x14   : > { %s622_s12 = scalar_lea.hbm %s1063_s0, 256  ;;  %p623_p0 = scmp.lt.u32.totalorder %s872_s29, %s1063_s0 }
  0x15   : > { %p620_p12 = pnand %p619_p11, %p618_p10  ;;  %p624_p2 = scmp.lt.u32.totalorder %s622_s12, %s617_s6 }
  0x16   : > { %p626_p5 = scmp.lt.u32.totalorder %s617_s6, %s872_s29 }
  0x17   : > { %p621_p13 = pneg %p620_p12  ;;  %p625_p4 = por %p624_p2, %p623_p0 }
  0x19   : > { %p627_p1 = por %p626_p5, %p625_p4 }
  0x1b   : > { %p628_p8 = pnand %p627_p1, %p621_p13 }
  0x1d   : > { %631 = shalt.err (!%p628_p8)
}
  0x1e   : > { %s632_s24 = scalar_lea.vmem %s874_s3, 128  ;;  %s773_s26 = smov [#allocation5]  }
  0x1f   : > { %p633_p10 = scmp.ne.s32.totalorder %s874_s3, %s632_s24  ;;  %s637_s27 = sshll.u32 %s773_s26, 4  ;;  %s638_s27 = int_to_ptr.vmem [resolvable:$false] %s637_s27 }
  0x20   : > { %s639_s28 = scalar_lea.vmem %s638_s27, 256  ;;  %p640_p6 = scmp.lt.s32.totalorder %s874_s3, %s638_s27 }
  0x21   : > { %p635_p12 = pnand %p633_p10, %p619_p11  ;;  %p641_p0 = scmp.lt.s32.totalorder %s639_s28, %s632_s24 }
  0x23   : > { %p636_p9 = pneg %p635_p12  ;;  %p642_p2 = por %p641_p0, %p640_p6 }
  0x25   : > { %p643_p5 = pnand %p642_p2, %p636_p9 }
  0x27   : > { %646 = shalt.err (!%p643_p5)
}
  0x28   : > { %503 = dma.hbm_to_vmem [thread:$0]  (!%p878_p7), %s872_s29, 128, %s874_s3, %s127_s5  }
  0x29   : > { %p1073_p1 = scmp.lt.s32.totalorder %s771_s19, 5  ;;  %p1074_p6 = scmp.ge.s32.totalorder %s771_s19, 1 }
  0x2a   : > { %s37_s4 = sadd.s32 1, %s751_s14  ;;  %s27_s6 = sadd.s32 1, %s763_s17 }
  0x2b   : > { %p913_p8 = pnand %p1074_p6, %p1073_p1  ;;  %p28_p9 = scmp.ge.s32.totalorder %s27_s6, 2 }
  0x2c   : > { %s63_s7 = sadd.s32 1, %s739_s11  ;;  %p70_p11 = scmp.ne.s32.totalorder %s739_s11, %s735_s10 }
  0x2d   : > { %p76_p13 = scmp.ne.s32.totalorder %s735_s10, %s731_s9  ;;  %s1094_s6 = smov (%p28_p9, %s27_s6), 0 }
  0x2e   : > { %s1096_s21 = smov (!%p28_p9, %s30_s21), %s767_s18  ;;  %s60_s29 = ssub.s32 %s763_s17, %s1094_s6 }
  0x2f   : > { %s144_s3 = sand.u32 1, %s739_s11   ;;  %p32_p7 = scmp.ge.s32.totalorder %s1096_s21, 2 }
  0x30   : > { %p61_p4 = scmp.eq.s32.totalorder %s60_s29, 0  ;;  %p1076_p10 = scmp.eq.s32.totalorder %s771_s19, 0 }
  0x31   : > { %p940_p0 = por %p76_p13, %p854_p3  ;;  %s1098_s21 = smov (%p32_p7, %s1096_s21), 0 }
  0x32   : > { %p934_p12 = por %p70_p11, %p1076_p10  ;;  %s34_s12 = ssub.s32 %s767_s18, %s1098_s21 }
  0x33   : > { %s1078_s9 = scalar_select %p940_p0, 1, 0 }
  0x34   : > { %s947_s8 = scalar_select %p61_p4, %s739_s11, %s63_s7  }
  0x35   : > { %s476_s20 = sshll.u32 %s144_s3, 3  ;;  %p35_p2 = scmp.eq.s32.totalorder %s34_s12, 0 }
  0x36   : > { %s477_s25 = sshll.u32 %s763_s17, 7  ;;  %s148_s24 = scalar_lea.vmem [#allocation7], %s476_s20 }
  0x37   : > { %s155_s26 = sshll.u32 %s148_s24, 4  ;;  %s958_s29 = scalar_lea.hbm %s1064_s1, %s477_s25  ;;  %s960_s26 = int_to_ptr.vmem [resolvable:$true] %s155_s26 }
  0x38   : > { %s953_s27 = scalar_select %p35_p2, %s751_s14, %s37_s4  }
  0x39   : > { %p1079_p3 = scmp.lt.s32.totalorder %s771_s19, 4  ;;  %s145_s4 = scalar_lea.sflag [#allocation8], %s144_s3 }
  0x3a   : > { %s647_s12 = scalar_lea.hbm %s958_s29, 128  ;;  %s652_s5 = scalar_lea.hbm %s1064_s1, 256 }
  0x3b   : > { %p966_p5 = pnand %p1079_p3, %p934_p12  ;;  %p648_p1 = scmp.ne.s32.totalorder %s958_s29, %s647_s12 }
  0x3c   : > { %p653_p13 = scmp.lt.u32.totalorder %s958_s29, %s1064_s1  ;;  %p654_p7 = scmp.lt.u32.totalorder %s652_s5, %s647_s12 }
  0x3d   : > { %p649_p6 = pneg %p966_p5  ;;  %p656_p10 = scmp.lt.u32.totalorder %s647_s12, %s958_s29 }
  0x3e   : > { %p655_p4 = por %p654_p7, %p653_p13 }
  0x3f   : > { %p650_p9 = pnand %p649_p6, %p648_p1 }
  0x40   : > { %p657_p12 = por %p656_p10, %p655_p4 }
  0x41   : > { %p651_p11 = pneg %p650_p9 }
  0x43   : > { %p658_p2 = pnand %p657_p12, %p651_p11 }
  0x45   : > { %661 = shalt.err (!%p658_p2)
}
  0x46   : > { %s662_s3 = scalar_lea.vmem %s960_s26, 128  ;;  %s774_s22 = smov [#allocation7]  }
  0x47   : > { %p663_p3 = scmp.ne.s32.totalorder %s960_s26, %s662_s3  ;;  %s667_s20 = sshll.u32 %s774_s22, 4  ;;  %s668_s20 = int_to_ptr.vmem [resolvable:$false] %s667_s20 }
  0x48   : > { %s669_s25 = scalar_lea.vmem %s668_s20, 256  ;;  %p670_p0 = scmp.lt.s32.totalorder %s960_s26, %s668_s20 }
  0x49   : > { %p665_p1 = pnand %p663_p3, %p649_p6  ;;  %p671_p13 = scmp.lt.s32.totalorder %s669_s25, %s662_s3 }
  0x4b   : > { %p666_p9 = pneg %p665_p1  ;;  %p672_p7 = por %p671_p13, %p670_p0 }
  0x4d   : > { %p673_p4 = pnand %p672_p7, %p666_p9 }
  0x4f   : > { %676 = shalt.err (!%p673_p4)
}
  0x50   : > { %506 = dma.hbm_to_vmem [thread:$0]  (!%p966_p5), %s958_s29, 128, %s960_s26, %s145_s4  }
  0x51   : > { %164 = sbr.rel (%p913_p8) target bundleno = 958 (0x3be), region = 28  ;;  %s166_s12 = sand.u32 (!%p913_p8), 1, %s747_s13  }
  0x52   : > { %s479_s5 = sshll.u32 (!%p913_p8), %s166_s12, 3  ;;  %s167_s24 = scalar_lea.sflag (!%p913_p8), [#allocation6], %s166_s12 }
  0x53   : > { %s170_s28 = scalar_lea.vmem (!%p913_p8), [#allocation5], %s479_s5  ;;  %p1081_p6 = scmp.ne.s32.totalorder (!%p913_p8), %s1071_s23, 0 }
  0x58   : > { %722 = dma.done.wait (%p1081_p6), %s167_s24, 128  }
  0x59   : > { %724 = vsyncadd (%p1081_p6), %s167_s24, 4294967168  ;;  %s175_s7 = sand.u32 1, %s735_s10   ;;  %p1082_p0 = scmp.ne.s32.totalorder %s1078_s9, 0 }
  0x5a   : > { %s480_s3 = sshll.u32 %s175_s7, 3  ;;  %s176_s22 = scalar_lea.sflag [#allocation8], %s175_s7 }
  0x5b   : > { %s179_s26 = scalar_lea.vmem [#allocation7], %s480_s3 }
  0x5c   : > { %726 = dma.done.wait (%p1082_p0), %s176_s22, 128  }
  0x5d   : > { %728 = vsyncadd (%p1082_p0), %s176_s22, 4294967168  ;;  %p204_p8 = scmp.lt.s32.totalorder %s759_s16, 1  ;;  %p482_p5 = scmp.ne.s32.totalorder %s755_s15, 0 }
  0x5e   : > { %vm212_vm0 = vcmask (!%p482_p5), 7168   ;;  %v775_v0 = vmov (!%p482_p5), -inf   ;;  %v776_v1 = vmov (!%p482_p5), 0.0  }
  0x5f   : > { %s205_s30 = scalar_select %p204_p8, %s759_s16, 1 }
  0x60   : > { %211 = sbr.rel (%p482_p5) target bundleno = 103 (0x67), region = 40  ;;  %213 = vst.msk [vmem:[#allocation2] sm:$0xff] (!%p482_p5), %vm212_vm0, %v775_v0  ;;  %214 = vst.msk [vmem:[#allocation3] sm:$0xff] (!%p482_p5), %vm212_vm0, %v776_v1 }
  0x61   : > { %s481_s29 = sshll.u32 %s205_s30, 3 }
  0x62   : > { %s1012_s23 = scalar_lea.vmem %s1065_s2, %s481_s29 }
  0x67 PF: > { %v216_v2 = vld [vmem:[%s179_s26] sm:$0xff]  ;;  %vm218_vm1 = vcmask 261120   ;;  %v215_v3 = vld [vmem:[%s170_s28] sm:$0xff]  ;;  %v777_v8 = vmov 0.0   ;;  %vm778_vm2 = vmmov 0   ;;  %vm325_vm7 = vcmask 64512   ;;  %p485_p11 = scmp.ne.s32.totalorder %s755_s15, %s759_s16 }
  0x68   : > { %v229_v4 = vmul.f32 %v216_v2, %v216_v2  ;;  %v217_v5 = vmul.f32 %v215_v3, %v215_v3  ;;  %491 = vmatprep.subr.mxu0 %v777_v8  ;;  %493 = vmatprep.mubr.msk.f32.mxu0 %vm778_vm2, %v777_v8  ;;  %v779_v31 = vmov 0   ;;  %v324_v32 = vld [vmem:[#allocation2] sm:$0xff]  ;;  %vm347_vm8 = vcmask 7168   ;;  %v333_v43 = vld [vmem:[#allocation3] sm:$0xff] }
  0x69   : > { %601 = vset.pattern.permute.xlu1 %v779_v31  ;;  %602 = vset.pattern.permute.xlu0 %v779_v31 }
  0x6a   : > { %v230_v6 = vsel %vm218_vm1, %v229_v4, 0.0  ;;  %v219_v7 = vsel %vm218_vm1, %v217_v5, 0.0 }
  0x6b   : > { %231 = vadd.xlane.f32.xlu0 %v230_v6 }
  0x6f   : > { %220 = vadd.xlane.f32.xlu0 %v219_v7 }
  0xf8   : > { %v232_v9 = vpop.xlane.xlu0 %231 }
  0xf9   : > { %603 = vrsqrt.f32 %v232_v9  ;;  %vm235_vm3 = vcmp.eq.f32.partialorder %v232_v9, inf  ;;  %v238_v13 = vand.u32 2147483648, %v232_v9  ;;  %vm237_vm4 = vcmp.eq.f32.partialorder %v232_v9, 0.0 }
  0xfc   : > { %v221_v10 = vpop.xlane.xlu0 %220 }
  0xfd   : > { %605 = vrsqrt.f32 %v221_v10  ;;  %vm224_vm5 = vcmp.eq.f32.partialorder %v221_v10, inf  ;;  %v227_v19 = vand.u32 2147483648, %v221_v10  ;;  %vm226_vm6 = vcmp.eq.f32.partialorder %v221_v10, 0.0 }
 0x103   : > { %v604_v11 = vpop.eup %603 }
 0x104   : > { %v234_v12 = vmul.f32 %v604_v11, %v232_v9 }
 0x106   : > { %v236_v14 = vsel %vm235_vm3, %v232_v9, %v234_v12 }
 0x107   : > { %v606_v15 = vpop.eup %605  ;;  %v239_v16 = vsel %vm237_vm4, %v238_v13, %v236_v14 }
 0x108   : > { %v243_v17 = vmax.f32 %v239_v16, 1e-08  ;;  %v223_v18 = vmul.f32 %v606_v15, %v221_v10 }
 0x10a   : > { %607 = vrcp.f32 %v243_v17  ;;  %v225_v20 = vsel %vm224_vm5, %v221_v10, %v223_v18 }
 0x10b   : > { %v228_v21 = vsel %vm226_vm6, %v227_v19, %v225_v20 }
 0x10c   : > { %v240_v22 = vmax.f32 %v228_v21, 1e-08 }
 0x10e   : > { %609 = vrcp.f32 %v240_v22 }
 0x114   : > { %v608_v23 = vpop.eup %607 }
 0x115   : > { %v247_v24 = vmul.f32 %v608_v23, %v216_v2 }
 0x117   : > { %492 = vmatpush3.xpose.msk.msra.mxu0 %vm218_vm1, %v247_v24 }
 0x118   : > { %v610_v25 = vpop.eup %609 }
 0x119   : > { %v242_v26 = vmul.f32 2.0, %v610_v25 }
 0x11b   : > { %v246_v27 = vmul.f32 %v242_v26, %v215_v3 }
 0x11d   : > { %494 = vmatmul.mubr.msk.f32.vlgmr.msra.gmra.mrb[0].mxu0 %vm218_vm1, %v246_v27  ;;  %v354_v47 = vmul.f32 (!%p485_p11), %v247_v24, %v246_v27 }
 0x11f   : > { %v355_v48 = vsel (!%p485_p11), %vm218_vm1, %v354_v47, 0.0 }
 0x1f0   : > { %v320_v28 = vpop.f32.mrb[0].mxu0 }
 0x1f1   : > { %v495_v29 = vpop.f32.mrb[1].mxu0  ;;  %v326_v30 = vsel %vm325_vm7, %v320_v28, -inf }
 0x1f2   : > { %327 = vmax.xlane.f32.xlu1 %v326_v30 }
 0x27f   : > { %v328_v33 = vpop.xlane.xlu1 %327 }
 0x280   : > { %v329_v34 = vmax.f32 %v324_v32, %v328_v33 }
 0x282   : > { %v330_v35 = vsub.f32 %v324_v32, %v329_v34  ;;  %349 = vst.msk [vmem:[#allocation2] sm:$0xff] %vm347_vm8, %v329_v34  ;;  %337 = vperm.xlu1 %601, %v329_v34  }
 0x284   : > { %v331_v41 = vmul.f32 1.442695, %v330_v35 }
 0x301   : > { %v338_v36 = vpop.permute.xlu1 %337 }
 0x302   : > { %v340_v37 = vsub.f32 %v320_v28, %v338_v36 }
 0x304   : > { %v341_v38 = vmul.f32 1.442695, %v340_v37 }
 0x306   : > { %611 = vpow2.f32 %v341_v38 }
 0x307   : > { %613 = vpow2.f32 %v331_v41 }
 0x310   : > { %v612_v39 = vpop.eup %611 }
 0x311   : > { %v343_v40 = vsel %vm325_vm7, %v612_v39, 0.0  ;;  %v614_v42 = vpop.eup %613 }
 0x312   : > { %344 = vadd.xlane.f32.xlu0 %v343_v40  ;;  %v334_v44 = vmul.f32 %v614_v42, %v333_v43 }
 0x316   : > { %356 = vadd.xlane.f32.xlu0 (!%p485_p11), %v355_v48 }
 0x39c   : > { %353 = sbr.rel (%p485_p11) target bundleno = 933 (0x3a5), region = 44 }
 0x39f   : > { %v345_v45 = vpop.xlane.xlu0 %344 }
 0x3a0   : > { %v346_v46 = vadd.f32 %v345_v45, %v334_v44 }
 0x3a2   : > { %348 = vst.msk [vmem:[#allocation3] sm:$0xff] %vm347_vm8, %v346_v46 }
 0x3a3   : > { %v357_v49 = vpop.xlane.xlu0 %356 }
 0x3a4   : > { %358 = vst.msk [vmem:[#allocation4] sm:$0xff] %vm347_vm8, %v357_v49 }
 0x3a5 PF: > { %p486_p10 = scmp.ne.s32.totalorder %s755_s15, 1 }
 0x3a6   : > { %v363_v52 = vld [vmem:[#allocation2] sm:$0xff] (!%p486_p10) }
 0x3a7   : > { %362 = sbr.rel (%p486_p10) target bundleno = 958 (0x3be), region = 48 }
 0x3ab   : > { %v364_v50 = vld [vmem:[#allocation3] sm:$0xff] (!%p486_p10)  ;;  %v368_v54 = vld [vmem:[#allocation4] sm:$0xff] (!%p486_p10) }
 0x3ac   : > { %615 = vlog2.f32 (!%p486_p10), %v364_v50 }
 0x3b6   : > { %v616_v51 = vpop.eup %615 }
 0x3b7   : > { %v366_v53 = vmul.f32 0.6931472, %v616_v51 }
 0x3b9   : > { %v367_v55 = vadd.f32 %v366_v53, %v363_v52 }
 0x3bb   : > { %v369_v56 = vsub.f32 %v367_v55, %v368_v54 }
 0x3bd   : > { %370 = vst.msk [vmem:[%s1012_s23] sm:$0xff] %vm347_vm8, %v369_v56 }
 0x3be PF: > { %s18_s19 = sadd.s32 1, %s771_s19   ;;  %s1083_s9 = smov %s735_s10 }
 0x3bf   : > { %p15_p12 = scmp.ge.s32.totalorder %s18_s19, 6   ;;  %s1084_s10 = smov %s739_s11 }
 0x3c0   : > { %s1085_s11 = smov %s947_s8  ;;  %s1086_s12 = smov %s747_s13 }
 0x3c1   : > { %s1087_s13 = smov %s751_s14  ;;  %s1088_s14 = smov %s953_s27 }
 0x3c2   : > { %s1089_s15 = smov %s763_s17  ;;  %s1090_s16 = smov %s767_s18 }
 0x3c3   : > { %s1091_s17 = smov %s1094_s6  ;;  %s1092_s18 = smov %s1098_s21 }
 0x3c4   :  { %17 = sbr.rel (!%p15_p12) target bundleno = 9 (0x9), region = 93 }
 0x3cb   :  { %390 = vsyncpa [#allocation6], 1 }
 0x3cc   :  { %392 = vsyncpa [#allocation6 + $0x1], 1 }
 0x3cd   :  { %393 = vsyncpa [#allocation8], 1 }
 0x3ce   :  { %395 = vsyncpa [#allocation8 + $0x1], 1 }

</bundles_post_ra>
